<compile_context>
chip_gen: v6e
topology: v6e:2x2x1
jax: 0.10.0
libtpu: 0.0.40
codegen_flags: <defaults>
</compile_context>

<pallas_src>
import jax
import jax.numpy as jnp
from jax import lax
from jax.experimental import pallas as pl
from jax.experimental.pallas import tpu as pltpu


def _round_up(n, m):
    return ((n + m - 1) // m) * m


def autoencoder_kernel(x_ref, gw_ref, gb_ref, hw_ref, hb_ref, out_ref):
    """Fused forward: sigmoid(sigmoid(x @ Wg^T + bg) @ Wh^T + bh) on one batch tile.

    x_ref  : (TB, Q)      input user vectors (batch tile)
    gw_ref : (Kp, Q)      encoder weight, PyTorch layout, K padded to lane multiple
    gb_ref : (1, Kp)      encoder bias (zero-padded)
    hw_ref : (Q, Kp)      decoder weight, PyTorch layout, padded columns are ZERO
    hb_ref : (1, Q)       decoder bias
    out_ref: (TB, Q)      reconstructed user vectors
    """
    x = x_ref[...]

    # Encoder: contract x axis 1 with g_weight axis 1 (i.e. x @ Wg^T) on the MXU,
    # f32 accumulation.  No transpose materialized anywhere.
    z = lax.dot_general(
        x, gw_ref[...],
        dimension_numbers=(((1,), (1,)), ((), ())),
        preferred_element_type=jnp.float32,
    )
    z = z + gb_ref[...]
    encoded = jax.nn.sigmoid(z)          # exp lowers to the EUP slot

    # Decoder: contract encoded axis 1 with h_weight axis 1 (i.e. enc @ Wh^T).
    y = lax.dot_general(
        encoded, hw_ref[...],
        dimension_numbers=(((1,), (1,)), ((), ())),
        preferred_element_type=jnp.float32,
    )
    y = y + hb_ref[...]
    out_ref[...] = jax.nn.sigmoid(y).astype(out_ref.dtype)


def autoencoder_forward(x, g_weight, g_bias, h_weight, h_bias,
                        *, block_b=512, vmem_limit_bytes=48 << 20):
    """Forward pass of the AutoEncoder.

    x        : (B, Q)  user vectors
    g_weight : (K, Q)  nn.Linear(num_question, k).weight   (PyTorch layout)
    g_bias   : (K,)
    h_weight : (Q, K)  nn.Linear(k, num_question).weight   (PyTorch layout)
    h_bias   : (Q,)
    """
    B, Q = x.shape
    K = g_weight.shape[0]
    dtype = x.dtype

    # ---- lane-align the latent dim: K -> Kp (multiple of 128) ----------------
    Kp = _round_up(K, 128)
    pad_k = Kp - K
    gw = jnp.pad(g_weight, ((0, pad_k), (0, 0)))            # (Kp, Q), zero rows
    gb = jnp.pad(g_bias, (0, pad_k)).reshape(1, Kp)         # padded lanes -> z=0
    hw = jnp.pad(h_weight, ((0, 0), (0, pad_k)))            # (Q, Kp), ZERO cols
    hb = h_bias.reshape(1, Q)                                # (so sigmoid(0)=0.5
                                                             #  lanes contribute 0)

    # ---- batch tiling: TB rows per grid step, multiple of 8 (256-friendly) ---
    TB = min(block_b, _round_up(B, 8))
    TB = _round_up(TB, 8)
    B_pad = _round_up(B, TB)
    if B_pad != B:
        x = jnp.pad(x, ((0, B_pad - B), (0, 0)))
    grid = (pl.cdiv(B_pad, TB),)

    out = pl.pallas_call(
        autoencoder_kernel,
        out_shape=jax.ShapeDtypeStruct((B_pad, Q), dtype),
        grid=grid,
        in_specs=[
            pl.BlockSpec((TB, Q), lambda i: (i, 0)),    # x: streamed per batch tile
            pl.BlockSpec((Kp, Q), lambda i: (0, 0)),    # weights/biases: resident
            pl.BlockSpec((1, Kp), lambda i: (0, 0)),
            pl.BlockSpec((Q, Kp), lambda i: (0, 0)),
            pl.BlockSpec((1, Q), lambda i: (0, 0)),
        ],
        out_specs=pl.BlockSpec((TB, Q), lambda i: (i, 0)),
        compiler_params=pltpu.CompilerParams(
            dimension_semantics=("parallel",),           # shard batch tiles on v7x
            vmem_limit_bytes=vmem_limit_bytes,           # headroom for v7x 64 MiB
        ),
    )(x, gw, gb, hw, hb)

    return out[:B]


def init_params(key, num_question, k=100, dtype=jnp.float32):
    """Deterministic init mimicking PyTorch nn.Linear default U(-1/sqrt(fan_in), +)."""
    k1, k2, k3, k4 = jax.random.split(key, 4)
    g_bound = 1.0 / jnp.sqrt(num_question)
    h_bound = 1.0 / jnp.sqrt(k)
    g_weight = jax.random.uniform(k1, (k, num_question), dtype, -g_bound, g_bound)
    g_bias = jax.random.uniform(k2, (k,), dtype, -g_bound, g_bound)
    h_weight = jax.random.uniform(k3, (num_question, k), dtype, -h_bound, h_bound)
    h_bias = jax.random.uniform(k4, (num_question,), dtype, -h_bound, h_bound)
    return g_weight, g_bias, h_weight, h_bias


if __name__ == "__main__":
    key = jax.random.PRNGKey(0)
    k_x, k_p = jax.random.split(key)

    batch = 8
    num_question = 256   # input/output feature dim
    k = 100              # latent dim (matches module default; padded to 128 inside)

    x = jax.random.uniform(k_x, (batch, num_question), jnp.float32)
    g_weight, g_bias, h_weight, h_bias = init_params(k_p, num_question, k)

    out = autoencoder_forward(x, g_weight, g_bias, h_weight, h_bias)
    out = jax.block_until_ready(out)

    # Reference check against plain JAX (same math as the PyTorch forward).
    enc_ref = jax.nn.sigmoid(x @ g_weight.T + g_bias)
    dec_ref = jax.nn.sigmoid(enc_ref @ h_weight.T + h_bias)
    assert out.shape == (batch, num_question)
    assert jnp.allclose(out, dec_ref, atol=1e-5), "mismatch vs reference"

    print("KERNEL_OK")
</pallas_src>

<mosaic_0001>
module attributes {stable_mosaic.version = 11 : i64} {
  func.func @autoencoder_kernel(%arg0: i32, %arg1: memref<8x256xf32, #tpu.memory_space<vmem>>, %arg2: memref<128x256xf32, #tpu.memory_space<vmem>>, %arg3: memref<1x128xf32, #tpu.memory_space<vmem>>, %arg4: memref<256x128xf32, #tpu.memory_space<vmem>>, %arg5: memref<1x256xf32, #tpu.memory_space<vmem>>, %arg6: memref<8x256xf32, #tpu.memory_space<vmem>>) attributes {dimension_semantics = [#tpu.dimension_semantics<parallel>], iteration_bounds = array<i64: 1>, scalar_prefetch = 0 : i64, scratch_operands = 0 : i64, tpu.core_type = #tpu.core_type<tc>, window_params = [{transform_indices = @transform_0, window_bounds = array<i64: 8, 256>}, {pipeline_mode = #tpu.pipeline_mode<synchronous>, transform_indices = @transform_1, window_bounds = array<i64: 128, 256>}, {pipeline_mode = #tpu.pipeline_mode<synchronous>, transform_indices = @transform_2, window_bounds = array<i64: 1, 128>}, {pipeline_mode = #tpu.pipeline_mode<synchronous>, transform_indices = @transform_3, window_bounds = array<i64: 256, 128>}, {pipeline_mode = #tpu.pipeline_mode<synchronous>, transform_indices = @transform_4, window_bounds = array<i64: 1, 256>}, {transform_indices = @transform_5, window_bounds = array<i64: 8, 256>}]} {
    %c0 = arith.constant 0 : index
    %c0_0 = arith.constant 0 : index
    %0 = vector.load %arg1[%c0, %c0_0] : memref<8x256xf32, #tpu.memory_space<vmem>>, vector<8x256xf32>
    %c0_1 = arith.constant 0 : index
    %c0_2 = arith.constant 0 : index
    %1 = vector.load %arg2[%c0_1, %c0_2] : memref<128x256xf32, #tpu.memory_space<vmem>>, vector<128x256xf32>
    %cst = arith.constant dense<0.000000e+00> : vector<8x128xf32>
    %2 = tpu.matmul %0, %1, %cst {dimension_numbers = #tpu.dot_dimension_numbers<[1], [1], [0], [0], [0, 0, 1, 0], [], []>} : vector<8x256xf32>, vector<128x256xf32>, vector<8x128xf32> -> vector<8x128xf32>
    %c0_3 = arith.constant 0 : index
    %c0_4 = arith.constant 0 : index
    %3 = vector.load %arg3[%c0_3, %c0_4] : memref<1x128xf32, #tpu.memory_space<vmem>>, vector<1x128xf32>
    %4 = vector.broadcast %3 : vector<1x128xf32> to vector<8x128xf32>
    %5 = arith.addf %2, %4 : vector<8x128xf32>
    %6 = arith.negf %5 : vector<8x128xf32>
    %7 = math.exp %6 : vector<8x128xf32>
    %cst_5 = arith.constant 1.000000e+00 : f32
    %8 = vector.broadcast %cst_5 : f32 to vector<8x128xf32>
    %9 = arith.addf %8, %7 : vector<8x128xf32>
    %10 = arith.divf %8, %9 : vector<8x128xf32>
    %c0_6 = arith.constant 0 : index
    %c0_7 = arith.constant 0 : index
    %11 = vector.load %arg4[%c0_6, %c0_7] : memref<256x128xf32, #tpu.memory_space<vmem>>, vector<256x128xf32>
    %cst_8 = arith.constant dense<0.000000e+00> : vector<8x256xf32>
    %12 = tpu.matmul %10, %11, %cst_8 {dimension_numbers = #tpu.dot_dimension_numbers<[1], [1], [0], [0], [0, 0, 1, 0], [], []>} : vector<8x128xf32>, vector<256x128xf32>, vector<8x256xf32> -> vector<8x256xf32>
    %c0_9 = arith.constant 0 : index
    %c0_10 = arith.constant 0 : index
    %13 = vector.load %arg5[%c0_9, %c0_10] : memref<1x256xf32, #tpu.memory_space<vmem>>, vector<1x256xf32>
    %14 = vector.broadcast %13 : vector<1x256xf32> to vector<8x256xf32>
    %15 = arith.addf %12, %14 : vector<8x256xf32>
    %16 = arith.negf %15 : vector<8x256xf32>
    %17 = math.exp %16 : vector<8x256xf32>
    %cst_11 = arith.constant 1.000000e+00 : f32
    %18 = vector.broadcast %cst_11 : f32 to vector<8x256xf32>
    %19 = arith.addf %18, %17 : vector<8x256xf32>
    %20 = arith.divf %18, %19 : vector<8x256xf32>
    %c0_12 = arith.constant 0 : index
    %c0_13 = arith.constant 0 : index
    %21 = vector.load %arg6[%c0_12, %c0_13] : memref<8x256xf32, #tpu.memory_space<vmem>>, vector<8x256xf32>
    tpu.vector_store %arg6[%c0_12, %c0_13], %20 {strides = array<i32>} : memref<8x256xf32, #tpu.memory_space<vmem>>, vector<8x256xf32>,
    return
  }
  func.func @transform_0(%arg0: i32) -> (i32, i32) {
    %c0_i32 = arith.constant 0 : i32
    %c0_i32_0 = arith.constant 0 : i32
    return %arg0, %c0_i32 : i32, i32
  }
  func.func @transform_1(%arg0: i32) -> (i32, i32) {
    %c0_i32 = arith.constant 0 : i32
    %c0_i32_0 = arith.constant 0 : i32
    %c0_i32_1 = arith.constant 0 : i32
    return %c0_i32, %c0_i32_0 : i32, i32
  }
  func.func @transform_2(%arg0: i32) -> (i32, i32) {
    %c0_i32 = arith.constant 0 : i32
    %c0_i32_0 = arith.constant 0 : i32
    %c0_i32_1 = arith.constant 0 : i32
    return %c0_i32, %c0_i32_0 : i32, i32
  }
  func.func @transform_3(%arg0: i32) -> (i32, i32) {
    %c0_i32 = arith.constant 0 : i32
    %c0_i32_0 = arith.constant 0 : i32
    %c0_i32_1 = arith.constant 0 : i32
    return %c0_i32, %c0_i32_0 : i32, i32
  }
  func.func @transform_4(%arg0: i32) -> (i32, i32) {
    %c0_i32 = arith.constant 0 : i32
    %c0_i32_0 = arith.constant 0 : i32
    %c0_i32_1 = arith.constant 0 : i32
    return %c0_i32, %c0_i32_0 : i32, i32
  }
  func.func @transform_5(%arg0: i32) -> (i32, i32) {
    %c0_i32 = arith.constant 0 : i32
    %c0_i32_0 = arith.constant 0 : i32
    return %arg0, %c0_i32 : i32, i32
  }
}

</mosaic_0001>

<bundles_post_ra>
// kernel: tpu_custom_call.1
= control target key start
LH: loop header
LB: loop body
LE: loop exit
PB: predicated region body
PF: predicated region fallthrough
CT: control target
= control target key end

     0   :  { %10 = vsyncpa [#allocation3], 0  ;;  %s522_s0 = inlined_call_operand.hbm [shape: f32[8,256], index: 0, kind: input, shape index: {}]   ;;  %s523_s1 = inlined_call_operand.hbm [shape: f32[128,256], index: 1, kind: input, shape index: {}]   ;;  %s524_s2 = inlined_call_operand.vmem [shape: f32[1,128], index: 2, kind: input, shape index: {}]   ;;  %s525_s3 = inlined_call_operand.hbm [shape: f32[256,128], index: 3, kind: input, shape index: {}]   ;;  %s526_s4 = inlined_call_operand.vmem [shape: f32[1,256], index: 4, kind: input, shape index: {}]   ;;  %s527_s5 = inlined_call_operand.hbm [shape: f32[8,256], index: 5, kind: output, shape index: {}]  }
   0x1   :  { %11 = vsyncpa [#allocation6], 0 }
   0x2   :  { %12 = vsyncpa [#allocation4], 0  ;;  %s466_s18 = smov [#allocation5]  }
   0x3   :  { %s28_s19 = sshll.u32 %s466_s18, 4  ;;  %s29_s19 = int_to_ptr.vmem [resolvable:$true] %s28_s19 }
   0x4   :  { %s388_s20 = scalar_lea.vmem %s29_s19, 4096  ;;  %p393_p1 = scmp.lt.s32.totalorder %s29_s19, %s29_s19 }
   0x5   :  { %p389_p0 = scmp.ne.s32.totalorder %s29_s19, %s388_s20  ;;  %p394_p2 = scmp.lt.s32.totalorder %s388_s20, %s388_s20 }
   0x7   :  { %p395_p3 = por %p394_p2, %p393_p1 }
   0x9   :  { %p396_p4 = pnand %p395_p3, %p389_p0 }
   0xb   :  { %399 = shalt.err (!%p396_p4)
}
   0xc   :  { %s467_s21 = smov 256   ;;  %s468_s22 = smov 16  }
   0xd   :  { %34 = dma.hbm_to_vmem [thread:$0]  %s523_s1, 4096, %s29_s19, [#allocation6], %s467_s21, %s467_s21, %s468_s22  }
   0xe   :  { %s469_s25 = smov [#allocation2]   ;;  %s470_s27 = smov [#allocation7]  }
   0xf   :  { %s19_s26 = sshll.u32 %s469_s25, 4  ;;  %s42_s28 = sshll.u32 %s470_s27, 4  ;;  %s20_s26 = int_to_ptr.vmem [resolvable:$true] %s19_s26  ;;  %s43_s28 = int_to_ptr.vmem [resolvable:$true] %s42_s28 }
  0x10   :  { %s408_s29 = scalar_lea.vmem %s20_s26, 256  ;;  %p413_p6 = scmp.lt.s32.totalorder %s20_s26, %s20_s26 }
  0x11   :  { %p409_p5 = scmp.ne.s32.totalorder %s20_s26, %s408_s29  ;;  %p414_p7 = scmp.lt.s32.totalorder %s408_s29, %s408_s29 }
  0x13   :  { %p415_p8 = por %p414_p7, %p413_p6 }
  0x15   :  { %p416_p9 = pnand %p415_p8, %p409_p5 }
  0x17   :  { %419 = shalt.err (!%p416_p9)
}
  0x18   :  { %22 = dma.hbm_to_vmem [thread:$0]  %s522_s0, 256, %s20_s26, [#allocation3]  }
  0x19   :  { %s428_s7 = scalar_lea.vmem %s43_s28, 4096  ;;  %p433_p11 = scmp.lt.s32.totalorder %s43_s28, %s43_s28 }
  0x1a   :  { %p429_p10 = scmp.ne.s32.totalorder %s43_s28, %s428_s7  ;;  %p434_p12 = scmp.lt.s32.totalorder %s428_s7, %s428_s7 }
  0x1c   :  { %p435_p13 = por %p434_p12, %p433_p11 }
  0x1e   :  { %p436_p0 = pnand %p435_p13, %p429_p10 }
  0x20   :  { %439 = shalt.err (!%p436_p0)
}
  0x21   :  { %s471_s1 = smov 128   ;;  %s472_s8 = smov 8  }
  0x22   :  { %48 = dma.hbm_to_vmem [thread:$0]  %s525_s3, 4096, %s43_s28, [#allocation6], %s471_s1, %s471_s1, %s472_s8  }
  0x23   :  { %460 = dma.done.wait [#allocation3], 256  }
  0x24   :  { %461 = vsyncadd [#allocation3], 4294967040 }
  0x25   :  { %462 = dma.done.wait [#allocation6], 8192  }
  0x26   :  { %463 = vsyncadd [#allocation6], 4294959104  ;;  %v93_v0 = vld [vmem:[#allocation5 + $0xf8] sm:$0xff]  ;;  %v92_v1 = vld [vmem:[#allocation5 + $0xf0] sm:$0xff] }
  0x27   :  { %v91_v2 = vld [vmem:[#allocation5 + $0xe8] sm:$0xff]  ;;  %101 = vmatprep.subr.mxu0 %v93_v0  ;;  %v90_v3 = vld [vmem:[#allocation5 + $0xe0] sm:$0xff]  ;;  %v89_v4 = vld [vmem:[#allocation5 + $0xd8] sm:$0xff] }
  0x28   :  { %102 = vmatpush1.xpose.msra.mxu0 %v92_v1  ;;  %v88_v5 = vld [vmem:[#allocation5 + $0xd0] sm:$0xff]  ;;  %v87_v6 = vld [vmem:[#allocation5 + $0xc8] sm:$0xff]  ;;  %v61_v7 = vld [vmem:[#allocation2 + $0x8] sm:$0xff] }
  0x29   :  { %103 = vmatprep.subr.mxu0 %v91_v2  ;;  %v86_v8 = vld [vmem:[#allocation5 + $0xc0] sm:$0xff]  ;;  %165 = vmatprep.mubr.f32.mxu0 %v61_v7  ;;  %v208_v9 = vld [vmem:[#allocation7 + $0xf8] sm:$0xff]  ;;  %v207_v12 = vld [vmem:[#allocation7 + $0xf0] sm:$0xff] }
  0x2a   :  { %v192_v10 = vld [vmem:[#allocation7 + $0x78] sm:$0xff]  ;;  %326 = vmatprep.subr.mxu1 %v208_v9  ;;  %v191_v13 = vld [vmem:[#allocation7 + $0x70] sm:$0xff]  ;;  %v206_v15 = vld [vmem:[#allocation7 + $0xe8] sm:$0xff] }
  0x2b   :  { %v85_v11 = vld [vmem:[#allocation5 + $0xb8] sm:$0xff]  ;;  %327 = vmatpush3.xpose.msra.mxu1 %v192_v10  ;;  %v84_v14 = vld [vmem:[#allocation5 + $0xb0] sm:$0xff]  ;;  %v83_v16 = vld [vmem:[#allocation5 + $0xa8] sm:$0xff]  ;;  %v211_v10 = vlaneseq }
  0x2c   :  { %104 = vmatpush1.xpose.msra.mxu0 %v90_v3  ;;  %328 = vmatprep.subr.mxu1 %v207_v12  ;;  %v190_v17 = vld [vmem:[#allocation7 + $0x68] sm:$0xff]  ;;  %v82_v18 = vld [vmem:[#allocation5 + $0xa0] sm:$0xff]  ;;  %v81_v20 = vld [vmem:[#allocation5 + $0x98] sm:$0xff] }
  0x2d   :  { %105 = vmatprep.subr.mxu0 %v89_v4  ;;  %v205_v19 = vld [vmem:[#allocation7 + $0xe0] sm:$0xff]  ;;  %v80_v22 = vld [vmem:[#allocation5 + $0x90] sm:$0xff]  ;;  %v204_v23 = vld [vmem:[#allocation7 + $0xd8] sm:$0xff] }
  0x2e   :  { %v189_v21 = vld [vmem:[#allocation7 + $0x60] sm:$0xff]  ;;  %v79_v24 = vld [vmem:[#allocation5 + $0x88] sm:$0xff]  ;;  %v188_v25 = vld [vmem:[#allocation7 + $0x58] sm:$0xff] }
  0x2f   :  { %329 = vmatpush3.xpose.msra.mxu1 %v191_v13  ;;  %v78_v26 = vld [vmem:[#allocation5 + $0x80] sm:$0xff]  ;;  %v203_v27 = vld [vmem:[#allocation7 + $0xd0] sm:$0xff]  ;;  %v77_v28 = vld [vmem:[#allocation5 + $0x78] sm:$0xff] }
  0x30   :  { %106 = vmatpush1.xpose.msra.mxu0 %v88_v5  ;;  %330 = vmatprep.subr.mxu1 %v206_v15  ;;  %v187_v29 = vld [vmem:[#allocation7 + $0x50] sm:$0xff]  ;;  %v202_v31 = vld [vmem:[#allocation7 + $0xc8] sm:$0xff]  ;;  %v74_v34 = vld [vmem:[#allocation5 + $0x60] sm:$0xff] }
  0x31   :  { %107 = vmatprep.subr.mxu0 %v87_v6  ;;  %v76_v30 = vld [vmem:[#allocation5 + $0x70] sm:$0xff]  ;;  %v75_v32 = vld [vmem:[#allocation5 + $0x68] sm:$0xff]  ;;  %v73_v35 = vld [vmem:[#allocation5 + $0x58] sm:$0xff] }
  0x32   :  { %v186_v33 = vld [vmem:[#allocation7 + $0x48] sm:$0xff]  ;;  %v72_v36 = vld [vmem:[#allocation5 + $0x50] sm:$0xff]  ;;  %v70_v38 = vld [vmem:[#allocation5 + $0x40] sm:$0xff] }
  0x33   :  { %331 = vmatpush3.xpose.msra.mxu1 %v190_v17  ;;  %v71_v37 = vld [vmem:[#allocation5 + $0x48] sm:$0xff]  ;;  %v69_v39 = vld [vmem:[#allocation5 + $0x38] sm:$0xff]  ;;  %v68_v40 = vld [vmem:[#allocation5 + $0x30] sm:$0xff] }
  0x34   :  { %108 = vmatpush1.xpose.msra.mxu0 %v86_v8  ;;  %332 = vmatprep.subr.mxu1 %v205_v19  ;;  %v67_v41 = vld [vmem:[#allocation5 + $0x28] sm:$0xff]  ;;  %v66_v42 = vld [vmem:[#allocation5 + $0x20] sm:$0xff]  ;;  %v65_v43 = vld [vmem:[#allocation5 + $0x18] sm:$0xff] }
  0x35   :  { %109 = vmatprep.subr.mxu0 %v85_v11  ;;  %v64_v44 = vld [vmem:[#allocation5 + $0x10] sm:$0xff]  ;;  %v63_v45 = vld [vmem:[#allocation5 + $0x8] sm:$0xff]  ;;  %v62_v46 = vld [vmem:[#allocation5] sm:$0xff]  ;;  %v212_v11 = vshrl.u32 %v211_v10, 7 }
  0x36   :  { %v60_v47 = vld [vmem:[#allocation2] sm:$0xff]  ;;  %v201_v48 = vld [vmem:[#allocation7 + $0xc0] sm:$0xff]  ;;  %v200_v50 = vld [vmem:[#allocation7 + $0xb8] sm:$0xff] }
  0x37   :  { %333 = vmatpush3.xpose.msra.mxu1 %v189_v21  ;;  %v185_v49 = vld [vmem:[#allocation7 + $0x40] sm:$0xff]  ;;  %v184_v51 = vld [vmem:[#allocation7 + $0x38] sm:$0xff]  ;;  %v199_v52 = vld [vmem:[#allocation7 + $0xb0] sm:$0xff]  ;;  %v213_v12 = vsub.s32 0, %v212_v11 }
  0x38   :  { %110 = vmatpush1.xpose.msra.mxu0 %v84_v14  ;;  %334 = vmatprep.subr.mxu1 %v204_v23  ;;  %v183_v53 = vld [vmem:[#allocation7 + $0x30] sm:$0xff]  ;;  %v198_v54 = vld [vmem:[#allocation7 + $0xa8] sm:$0xff]  ;;  %v197_v56 = vld [vmem:[#allocation7 + $0xa0] sm:$0xff]  ;;  %v217_v14 = vsub.s32 1, %v212_v11 }
  0x39   :  { %111 = vmatprep.subr.mxu0 %v83_v16  ;;  %v182_v55 = vld [vmem:[#allocation7 + $0x28] sm:$0xff]  ;;  %v181_v57 = vld [vmem:[#allocation7 + $0x20] sm:$0xff]  ;;  %v196_v58 = vld [vmem:[#allocation7 + $0x98] sm:$0xff] }
  0x3a   :  { %v180_v59 = vld [vmem:[#allocation7 + $0x18] sm:$0xff]  ;;  %v195_v60 = vld [vmem:[#allocation7 + $0x90] sm:$0xff]  ;;  %v194_v62 = vld [vmem:[#allocation7 + $0x88] sm:$0xff] }
  0x3b   :  { %335 = vmatpush3.xpose.msra.mxu1 %v188_v25  ;;  %v179_v61 = vld [vmem:[#allocation7 + $0x10] sm:$0xff]  ;;  %v178_v63 = vld [vmem:[#allocation7 + $0x8] sm:$0xff]  ;;  %v193_v0 = vld [vmem:[#allocation7 + $0x80] sm:$0xff] }
  0x3c   :  { %112 = vmatpush1.xpose.msra.mxu0 %v82_v18  ;;  %336 = vmatprep.subr.mxu1 %v203_v27  ;;  %v177_v1 = vld [vmem:[#allocation7] sm:$0xff]  ;;  %v322_v2 = vld [vmem:[%s524_s2] ss:$0 sm:$0xff]  ;;  %s473_s2 = smov [#allocation8]  }
  0x3d   :  { %113 = vmatprep.subr.mxu0 %v81_v20  ;;  %v209_v13 = vld [vmem:[%s526_s4] sm:$0x3]  ;;  %s312_s13 = sshll.u32 %s473_s2, 4  ;;  %s313_s13 = int_to_ptr.vmem [resolvable:$true] %s312_s13 }
  0x3e   :  { %v214_v15 = vrot.slane %v209_v13, %v213_v12  ;;  %v218_v16 = vrot.slane %v209_v13, %v217_v14  ;;  %s440_s4 = scalar_lea.vmem %s313_s13, 256  ;;  %p445_p2 = scmp.lt.s32.totalorder %s313_s13, %s313_s13 }
  0x3f   :  { %337 = vmatpush3.xpose.msra.mxu1 %v187_v29  ;;  %p441_p1 = scmp.ne.s32.totalorder %s313_s13, %s440_s4  ;;  %p446_p3 = scmp.lt.s32.totalorder %s440_s4, %s440_s4 }
  0x40   :  { %114 = vmatpush1.xpose.msra.mxu0 %v80_v22  ;;  %338 = vmatprep.subr.mxu1 %v202_v31 }
  0x41   :  { %115 = vmatprep.subr.mxu0 %v79_v24  ;;  %p447_p4 = por %p446_p3, %p445_p2 }
  0x43   :  { %339 = vmatpush3.xpose.msra.mxu1 %v186_v33  ;;  %p448_p5 = pnand %p447_p4, %p441_p1 }
  0x44   :  { %116 = vmatpush1.xpose.msra.mxu0 %v78_v26  ;;  %340 = vmatprep.subr.mxu1 %v201_v48 }
  0x45   :  { %117 = vmatprep.subr.mxu0 %v77_v28 }
  0x47   :  { %341 = vmatpush3.xpose.msra.mxu1 %v185_v49 }
  0x48   :  { %118 = vmatpush1.xpose.msra.mxu0 %v76_v30  ;;  %342 = vmatprep.subr.mxu1 %v200_v50 }
  0x49   :  { %119 = vmatprep.subr.mxu0 %v75_v32 }
  0x4b   :  { %343 = vmatpush3.xpose.msra.mxu1 %v184_v51 }
  0x4c   :  { %120 = vmatpush1.xpose.msra.mxu0 %v74_v34  ;;  %344 = vmatprep.subr.mxu1 %v199_v52 }
  0x4d   :  { %121 = vmatprep.subr.mxu0 %v73_v35 }
  0x4f   :  { %345 = vmatpush3.xpose.msra.mxu1 %v183_v53 }
  0x50   :  { %122 = vmatpush1.xpose.msra.mxu0 %v72_v36  ;;  %346 = vmatprep.subr.mxu1 %v198_v54 }
  0x51   :  { %123 = vmatprep.subr.mxu0 %v71_v37 }
  0x53   :  { %347 = vmatpush3.xpose.msra.mxu1 %v182_v55 }
  0x54   :  { %124 = vmatpush1.xpose.msra.mxu0 %v70_v38  ;;  %348 = vmatprep.subr.mxu1 %v197_v56 }
  0x55   :  { %125 = vmatprep.subr.mxu0 %v69_v39 }
  0x57   :  { %349 = vmatpush3.xpose.msra.mxu1 %v181_v57 }
  0x58   :  { %126 = vmatpush1.xpose.msra.mxu0 %v68_v40  ;;  %350 = vmatprep.subr.mxu1 %v196_v58 }
  0x59   :  { %127 = vmatprep.subr.mxu0 %v67_v41 }
  0x5b   :  { %351 = vmatpush3.xpose.msra.mxu1 %v180_v59 }
  0x5c   :  { %128 = vmatpush1.xpose.msra.mxu0 %v66_v42  ;;  %352 = vmatprep.subr.mxu1 %v195_v60 }
  0x5d   :  { %129 = vmatprep.subr.mxu0 %v65_v43 }
  0x5f   :  { %353 = vmatpush3.xpose.msra.mxu1 %v179_v61 }
  0x60   :  { %130 = vmatpush1.xpose.msra.mxu0 %v64_v44  ;;  %354 = vmatprep.subr.mxu1 %v194_v62 }
  0x61   :  { %131 = vmatprep.subr.mxu0 %v63_v45 }
  0x63   :  { %355 = vmatpush3.xpose.msra.mxu1 %v178_v63 }
  0x64   :  { %132 = vmatpush1.xpose.msra.mxu0 %v62_v46  ;;  %356 = vmatprep.subr.mxu1 %v193_v0 }
  0x67   :  { %166 = vmatmul.mubr.f32.vlgmr.msra.gmra.mxu0 %v60_v47  ;;  %357 = vmatpush3.xpose.msra.mxu1 %v177_v1 }
 0x127   :  { %v167_v3 = vpop.f32.mrf.mxu0 }
 0x128   :  { %v168_v4 = vadd.f32 %v322_v2, %v167_v3 }
 0x129   :  { %v169_v5 = vpop.f32.mrf.mxu0 }
 0x12a   :  { %v323_v6 = vmul.f32 -1.442695, %v168_v4 }
 0x12c   :  { %368 = vpow2.f32 %v323_v6 }
 0x139   :  { %v369_v7 = vpop.eup %368 }
 0x13a   :  { %v174_v8 = vadd.f32 1.0, %v369_v7 }
 0x13c   :  { %370 = vrcp.f32 %v174_v8 }
 0x149   :  { %v371_v9 = vpop.eup %370 }
 0x14a   :  { %358 = vmatprep.mubr.f32.mxu1 %v371_v9 }
 0x14b   :  { %359 = vmatmul.mubr.f32.vlgmr.msra.gmra.mxu1 %v371_v9 }
 0x20b   :  { %v287_v17 = vpop.f32.mrf.mxu1 }
 0x20c   :  { %v288_v18 = vadd.f32 %v287_v17, %v214_v15 }
 0x20d   :  { %v289_v19 = vpop.f32.mrf.mxu1 }
 0x20e   :  { %v324_v20 = vmul.f32 -1.442695, %v288_v18  ;;  %v290_v21 = vadd.f32 %v289_v19, %v218_v16 }
 0x210   :  { %372 = vpow2.f32 %v324_v20  ;;  %v325_v22 = vmul.f32 -1.442695, %v290_v21 }
 0x212   :  { %374 = vpow2.f32 %v325_v22 }
 0x21d   :  { %v373_v23 = vpop.eup %372 }
 0x21e   :  { %v298_v24 = vadd.f32 1.0, %v373_v23 }
 0x21f   :  { %v375_v25 = vpop.eup %374 }
 0x220   :  { %376 = vrcp.f32 %v298_v24  ;;  %v299_v26 = vadd.f32 1.0, %v375_v25 }
 0x222   :  { %378 = vrcp.f32 %v299_v26 }
 0x22d   :  { %v377_v27 = vpop.eup %376 }
 0x22e   :  { %304 = vst [vmem:[#allocation8] sm:$0xff] %v377_v27 }
 0x22f   :  { %v379_v28 = vpop.eup %378 }
 0x230   :  { %305 = vst [vmem:[#allocation8 + $0x8] sm:$0xff] %v379_v28 }
 0x231   :  { %451 = shalt.err (!%p448_p5)
}
 0x232   :  { %315 = dma.vmem_to_hbm [thread:$0]  %s313_s13, 256, %s527_s5, [#allocation4]  }
 0x233   :  { %464 = dma.done.wait [#allocation4], 256  }
 0x234   :  { %465 = vsyncadd [#allocation4], 4294967040 }
 0x235   :  { %319 = vsyncpa [#allocation3], 1 }
 0x236   :  { %320 = vsyncpa [#allocation6], 1 }
 0x237   :  { %321 = vsyncpa [#allocation4], 1 }

</bundles_post_ra>
